<compile_context>
chip_gen: v7x
topology: tpu7x:2x2x1
jax: 0.10.0
libtpu: 0.0.40
codegen_flags: <defaults>
</compile_context>

<pallas_src>
import functools

import jax
import jax.numpy as jnp
from jax import lax
from jax.experimental import pallas as pl
from jax.experimental.pallas import tpu as pltpu

_SMOOTH = 0.0001
_LANES = 128
_SUBLANES = 8
_GRAN = _SUBLANES * _LANES            # 1024: reshape granularity
_MAX_TILE_ROWS = 512                  # up to 512 sublane rows (64K px) / step
_VMEM_INPUT_BUDGET = 16 * 1024 * 1024  # double-buffered input blocks (bytes)


def _dice_weight_kernel(predict_ref, label_ref, weight_ref,
                        int_ref, t_ref, pp_ref,
                        acc_int, acc_t, acc_pp,
                        *, s_rows, tiles_per_split, full_tiles, ragged):
    """One (batch, split, spatial-tile) grid step.

    predict_ref: (1, C, TS, 128)   predictions (input dtype; cast to f32 here)
    label_ref:   (1, 1, TS, 128)   class ids (compared to i in input dtype)
    weight_ref:  (1, 1, TS, 128)   per-pixel weights
    int/t/pp_ref:(1, 1, C, 128)    f32 per-(batch, split) partial sums
    acc_*:       (C, 8, 128)       f32 VMEM accumulators, persistent across
                                   the spatial grid axis, reset per (n, p).
    """
    s = pl.program_id(2)
    split = pl.program_id(1)
    n_classes = predict_ref.shape[1]
    ts = predict_ref.shape[2]
    nblk = ts // _SUBLANES
    tile_idx = split * tiles_per_split + s

    @pl.when(s == 0)
    def _init():
        acc_int[...] = jnp.zeros_like(acc_int)
        acc_t[...] = jnp.zeros_like(acc_t)
        acc_pp[...] = jnp.zeros_like(acc_pp)

    def accumulate(masked):
        # 3*C register accumulators carried across the (unrolled) row-block
        # loop; spilled to VMEM scratch once per tile, not once per vreg.
        reg_int = [jnp.zeros((_SUBLANES, _LANES), jnp.float32)
                   for _ in range(n_classes)]
        reg_t = [jnp.zeros((_SUBLANES, _LANES), jnp.float32)
                 for _ in range(n_classes)]
        reg_pp = [jnp.zeros((_SUBLANES, _LANES), jnp.float32)
                  for _ in range(n_classes)]
        if masked:
            base_rows = lax.broadcasted_iota(jnp.int32, (_SUBLANES, _LANES), 0)
            row_limit = s_rows - tile_idx * ts   # traced scalar

        for r in range(nblk):                    # static unroll (nblk <= 64)
            off = r * _SUBLANES
            lab = label_ref[0, 0, pl.ds(off, _SUBLANES), :]
            w = weight_ref[0, 0, pl.ds(off, _SUBLANES), :].astype(jnp.float32)
            if masked:
                valid = (base_rows + off) < row_limit
                # where (not *0): keeps NaN/Inf garbage in the out-of-bounds
                # rows of a ragged tile from polluting the sums.
                w = jnp.where(valid, w, 0.0)
            w2 = w * w
            for i in range(n_classes):
                p = predict_ref[0, i, pl.ds(off, _SUBLANES), :].astype(jnp.float32)
                if masked:
                    p = jnp.where(valid, p, 0.0)
                m = lab == i                     # one-hot, matches torch ==
                a = p * w2
                reg_int[i] = reg_int[i] + jnp.where(m, a, 0.0)   # sum p*t*w^2
                reg_t[i] = reg_t[i] + jnp.where(m, w, 0.0)       # sum t*w
                reg_pp[i] = reg_pp[i] + p * a                    # sum p^2*w^2

        for i in range(n_classes):
            acc_int[i] += reg_int[i]
            acc_t[i] += reg_t[i]
            acc_pp[i] += reg_pp[i]

    if ragged:
        if full_tiles > 0:
            @pl.when(tile_idx < full_tiles)
            def _full_tile():
                accumulate(masked=False)

        @pl.when(tile_idx >= full_tiles)
        def _tail_tile():
            accumulate(masked=True)
    else:
        accumulate(masked=False)

    @pl.when(s == pl.num_programs(2) - 1)
    def _finalize():
        # Sublane-only reduce; the cheap cross-lane reduce happens in JAX.
        int_ref[0, 0] = jnp.sum(acc_int[...], axis=1)    # (C, 128)
        t_ref[0, 0] = jnp.sum(acc_t[...], axis=1)
        pp_ref[0, 0] = jnp.sum(acc_pp[...], axis=1)


def _choose_tile_rows(s_rows, n_channels):
    """Sublane rows per spatial tile: as large as possible (<= 512) while the
    double-buffered input blocks stay inside a conservative VMEM budget."""
    budget_rows = _VMEM_INPUT_BUDGET // (2 * (n_channels + 2) * _LANES * 4)
    budget_rows = max(_SUBLANES, (budget_rows // _SUBLANES) * _SUBLANES)
    return max(_SUBLANES, min(_MAX_TILE_ROWS, s_rows, budget_rows))


@functools.partial(jax.jit, static_argnames=("num_classes", "alpha"))
def dice_loss_weight(predict, label, weight, *, num_classes, alpha=1.0):
    """JAX/Pallas equivalent of DiceLoss_weight(num_classes, alpha).forward.

    alpha is stored-but-unused by the torch forward; kept for parity.
    Pass predict as bfloat16 for best HBM throughput on v5e/v6e (the kernel
    accumulates in float32 either way).
    """
    # 5-D label glue (plain JAX), mirrors the torch forward:
    # [N, C, D, H, W] -> [N*D, C, H, W]
    if label.ndim == 5:
        n5, c5, d5, h5, w5 = label.shape
        label = jnp.transpose(label, (0, 2, 1, 3, 4)).reshape(n5 * d5, c5, h5, w5)

    N, C, H, W = predict.shape
    assert C == num_classes, (C, num_classes)
    assert label.shape == (N, 1, H, W), (label.shape, predict.shape)
    HW = H * W

    # Pad only to the 8x128 reshape granularity (usually a no-op); padded
    # pixels get predict 0 and weight 0, so they contribute exactly 0.
    hw_pad = -(-HW // _GRAN) * _GRAN
    s_rows = hw_pad // _LANES

    p3 = predict.reshape(N, C, HW)
    l3 = label.reshape(N, 1, HW)
    w3 = jnp.broadcast_to(weight, (N, H, W)).reshape(N, 1, HW)
    if hw_pad != HW:
        pad = ((0, 0), (0, 0), (0, hw_pad - HW))
        p3 = jnp.pad(p3, pad)
        l3 = jnp.pad(l3, pad)
        w3 = jnp.pad(w3, pad)

    p4 = p3.reshape(N, C, s_rows, _LANES)
    l4 = l3.reshape(N, 1, s_rows, _LANES)
    w4 = w3.reshape(N, 1, s_rows, _LANES)

    ts = _choose_tile_rows(s_rows, C)
    n_tiles = pl.cdiv(s_rows, ts)
    full_tiles = s_rows // ts          # tiles with no out-of-bounds rows

    # Optional 2-way parallel split of the spatial axis so both v7x
    # TensorCores get work even when the batch axis alone can't balance them.
    n_splits = 2 if (N % 2 == 1 and n_tiles >= 2) else 1
    tps = pl.cdiv(n_tiles, n_splits)
    ragged = (n_splits * tps != full_tiles)     # some tile needs row masking
    need_clamp = (n_splits * tps != n_tiles)    # some tile index overflows

    if need_clamp:
        def sp_idx(n, p, s):
            return (n, 0, jnp.minimum(p * tps + s, n_tiles - 1), 0)
    else:
        def sp_idx(n, p, s):
            return (n, 0, p * tps + s, 0)

    kernel = functools.partial(
        _dice_weight_kernel, s_rows=s_rows, tiles_per_split=tps,
        full_tiles=full_tiles, ragged=ragged)

    grid_spec = pltpu.PrefetchScalarGridSpec(
        num_scalar_prefetch=0,
        grid=(N, n_splits, tps),
        in_specs=[
            pl.BlockSpec((1, C, ts, _LANES), sp_idx),
            pl.BlockSpec((1, 1, ts, _LANES), sp_idx),
            pl.BlockSpec((1, 1, ts, _LANES), sp_idx),
        ],
        out_specs=[
            pl.BlockSpec((1, 1, C, _LANES), lambda n, p, s: (n, p, 0, 0)),
            pl.BlockSpec((1, 1, C, _LANES), lambda n, p, s: (n, p, 0, 0)),
            pl.BlockSpec((1, 1, C, _LANES), lambda n, p, s: (n, p, 0, 0)),
        ],
        scratch_shapes=[pltpu.VMEM((C, _SUBLANES, _LANES), jnp.float32)] * 3,
    )

    int_p, t_p, pp_p = pl.pallas_call(
        kernel,
        out_shape=(
            jax.ShapeDtypeStruct((N, n_splits, C, _LANES), jnp.float32),
            jax.ShapeDtypeStruct((N, n_splits, C, _LANES), jnp.float32),
            jax.ShapeDtypeStruct((N, n_splits, C, _LANES), jnp.float32),
        ),
        grid_spec=grid_spec,
        compiler_params=pltpu.CompilerParams(
            dimension_semantics=("parallel", "parallel", "arbitrary"),
            vmem_limit_bytes=32 * 1024 * 1024,
        ),
    )(p4, l4, w4)

    # Tiny final reductions + dice formula (N*P*C*128 elements per stream).
    intersect = jnp.sum(int_p, axis=(0, 1, 3))      # (C,)
    sum_t = jnp.sum(t_p, axis=(0, 1, 3))
    sum_pp = jnp.sum(pp_p, axis=(0, 1, 3))
    dice = (2.0 * intersect + _SMOOTH) / (sum_t + sum_pp + _SMOOTH)
    return jnp.sum(1.0 - dice) / num_classes


def _reference(predict, label, weight, num_classes):
    """Pure-JAX reference mirroring the PyTorch module."""
    smooth = 0.0001
    label = label.astype(jnp.float32)
    loss = 0.0
    for i in range(num_classes):
        t = (label[:, 0] == float(i)).astype(jnp.float32) * weight
        p = predict[:, i] * weight
        intersect = jnp.sum(p * t)
        dice = (2.0 * intersect + smooth) / (jnp.sum(t) + jnp.sum(p * p) + smooth)
        loss = loss + (1.0 - dice)
    return loss / num_classes


def _run_case(key, N, C, H, W, atol, rtol):
    k1, k2, k3 = jax.random.split(key, 3)
    predict = jax.nn.softmax(jax.random.normal(k1, (N, C, H, W), jnp.float32), axis=1)
    label = jax.random.randint(k2, (N, 1, H, W), 0, C).astype(jnp.float32)
    weight = jax.random.uniform(k3, (N, H, W), dtype=jnp.float32)
    loss = jax.block_until_ready(
        dice_loss_weight(predict, label, weight, num_classes=C))
    ref = _reference(predict, label, weight, C)
    assert jnp.allclose(loss, ref, atol=atol, rtol=rtol), (N, C, H, W, loss, ref)


if __name__ == "__main__":
    key = jax.random.PRNGKey(0)
    k1, k2 = jax.random.split(key)
    # Small aligned case: single spatial tile, no masking path.
    _run_case(k1, N=2, C=4, H=16, W=16, atol=1e-5, rtol=1e-5)
    # Ragged / odd-batch case: exercises large (512-row) tiles, the masked
    # tail-tile path and the 2-way parallel spatial split.
    _run_case(k2, N=1, C=2, H=258, W=258, atol=1e-4, rtol=1e-4)
    print("KERNEL_OK")
</pallas_src>

<mosaic_0001>
module attributes {stable_mosaic.version = 11 : i64} {
  func.func @_dice_weight_kernel(%arg0: i32, %arg1: i32, %arg2: i32, %arg3: memref<1x4x8x128xf32, #tpu.memory_space<vmem>>, %arg4: memref<1x1x8x128xf32, #tpu.memory_space<vmem>>, %arg5: memref<1x1x8x128xf32, #tpu.memory_space<vmem>>, %arg6: memref<1x1x4x128xf32, #tpu.memory_space<vmem>>, %arg7: memref<1x1x4x128xf32, #tpu.memory_space<vmem>>, %arg8: memref<1x1x4x128xf32, #tpu.memory_space<vmem>>, %arg9: memref<4x8x128xf32, #tpu.memory_space<vmem>>, %arg10: memref<4x8x128xf32, #tpu.memory_space<vmem>>, %arg11: memref<4x8x128xf32, #tpu.memory_space<vmem>>) attributes {dimension_semantics = [#tpu.dimension_semantics<parallel>, #tpu.dimension_semantics<parallel>, #tpu.dimension_semantics<arbitrary>], iteration_bounds = array<i64: 2, 1, 1>, scalar_prefetch = 0 : i64, scratch_operands = 3 : i64, tpu.core_type = #tpu.core_type<tc>, window_params = [{transform_indices = @transform_0, window_bounds = array<i64: 1, 4, 8, 128>}, {transform_indices = @transform_1, window_bounds = array<i64: 1, 1, 8, 128>}, {transform_indices = @transform_2, window_bounds = array<i64: 1, 1, 8, 128>}, {transform_indices = @transform_3, window_bounds = array<i64: 1, 1, 4, 128>}, {transform_indices = @transform_4, window_bounds = array<i64: 1, 1, 4, 128>}, {transform_indices = @transform_5, window_bounds = array<i64: 1, 1, 4, 128>}]} {
    %c0_i32 = arith.constant 0 : i32
    %0 = arith.cmpi eq, %arg2, %c0_i32 : i32
    %1 = arith.extui %0 : i1 to i32
    %c0_i32_0 = arith.constant 0 : i32
    %2 = arith.cmpi ne, %1, %c0_i32_0 : i32
    scf.if %2 {
      %cst_118 = arith.constant 0.000000e+00 : f32
      %147 = vector.broadcast %cst_118 : f32 to vector<4x8x128xf32>
      %c0_119 = arith.constant 0 : index
      %c0_120 = arith.constant 0 : index
      %c0_121 = arith.constant 0 : index
      %148 = vector.load %arg9[%c0_119, %c0_120, %c0_121] : memref<4x8x128xf32, #tpu.memory_space<vmem>>, vector<4x8x128xf32>
      tpu.vector_store %arg9[%c0_119, %c0_120, %c0_121], %147 {strides = array<i32>} : memref<4x8x128xf32, #tpu.memory_space<vmem>>, vector<4x8x128xf32>,
      %cst_122 = arith.constant 0.000000e+00 : f32
      %149 = vector.broadcast %cst_122 : f32 to vector<4x8x128xf32>
      %c0_123 = arith.constant 0 : index
      %c0_124 = arith.constant 0 : index
      %c0_125 = arith.constant 0 : index
      %150 = vector.load %arg10[%c0_123, %c0_124, %c0_125] : memref<4x8x128xf32, #tpu.memory_space<vmem>>, vector<4x8x128xf32>
      tpu.vector_store %arg10[%c0_123, %c0_124, %c0_125], %149 {strides = array<i32>} : memref<4x8x128xf32, #tpu.memory_space<vmem>>, vector<4x8x128xf32>,
      %cst_126 = arith.constant 0.000000e+00 : f32
      %151 = vector.broadcast %cst_126 : f32 to vector<4x8x128xf32>
      %c0_127 = arith.constant 0 : index
      %c0_128 = arith.constant 0 : index
      %c0_129 = arith.constant 0 : index
      %152 = vector.load %arg11[%c0_127, %c0_128, %c0_129] : memref<4x8x128xf32, #tpu.memory_space<vmem>>, vector<4x8x128xf32>
      tpu.vector_store %arg11[%c0_127, %c0_128, %c0_129], %151 {strides = array<i32>} : memref<4x8x128xf32, #tpu.memory_space<vmem>>, vector<4x8x128xf32>,
    } else {
    }
    %cst = arith.constant 0.000000e+00 : f32
    %3 = vector.broadcast %cst : f32 to vector<8x128xf32>
    %cst_1 = arith.constant 0.000000e+00 : f32
    %4 = vector.broadcast %cst_1 : f32 to vector<8x128xf32>
    %cst_2 = arith.constant 0.000000e+00 : f32
    %5 = vector.broadcast %cst_2 : f32 to vector<8x128xf32>
    %cst_3 = arith.constant 0.000000e+00 : f32
    %6 = vector.broadcast %cst_3 : f32 to vector<8x128xf32>
    %cst_4 = arith.constant 0.000000e+00 : f32
    %7 = vector.broadcast %cst_4 : f32 to vector<8x128xf32>
    %cst_5 = arith.constant 0.000000e+00 : f32
    %8 = vector.broadcast %cst_5 : f32 to vector<8x128xf32>
    %cst_6 = arith.constant 0.000000e+00 : f32
    %9 = vector.broadcast %cst_6 : f32 to vector<8x128xf32>
    %cst_7 = arith.constant 0.000000e+00 : f32
    %10 = vector.broadcast %cst_7 : f32 to vector<8x128xf32>
    %cst_8 = arith.constant 0.000000e+00 : f32
    %11 = vector.broadcast %cst_8 : f32 to vector<8x128xf32>
    %cst_9 = arith.constant 0.000000e+00 : f32
    %12 = vector.broadcast %cst_9 : f32 to vector<8x128xf32>
    %cst_10 = arith.constant 0.000000e+00 : f32
    %13 = vector.broadcast %cst_10 : f32 to vector<8x128xf32>
    %cst_11 = arith.constant 0.000000e+00 : f32
    %14 = vector.broadcast %cst_11 : f32 to vector<8x128xf32>
    %c0 = arith.constant 0 : index
    %c0_12 = arith.constant 0 : index
    %c0_13 = arith.constant 0 : index
    %c0_14 = arith.constant 0 : index
    %15 = vector.load %arg4[%c0, %c0_12, %c0_13, %c0_14] : memref<1x1x8x128xf32, #tpu.memory_space<vmem>>, vector<1x1x8x128xf32>
    %16 = vector.shape_cast %15 : vector<1x1x8x128xf32> to vector<8x128xf32>
    %c0_15 = arith.constant 0 : index
    %c0_16 = arith.constant 0 : index
    %c0_17 = arith.constant 0 : index
    %c0_18 = arith.constant 0 : index
    %17 = vector.load %arg5[%c0_15, %c0_16, %c0_17, %c0_18] : memref<1x1x8x128xf32, #tpu.memory_space<vmem>>, vector<1x1x8x128xf32>
    %18 = vector.shape_cast %17 : vector<1x1x8x128xf32> to vector<8x128xf32>
    %19 = arith.mulf %18, %18 : vector<8x128xf32>
    %c0_19 = arith.constant 0 : index
    %c0_20 = arith.constant 0 : index
    %c0_21 = arith.constant 0 : index
    %c0_22 = arith.constant 0 : index
    %20 = vector.load %arg3[%c0_19, %c0_20, %c0_21, %c0_22] : memref<1x4x8x128xf32, #tpu.memory_space<vmem>>, vector<1x1x8x128xf32>
    %21 = vector.shape_cast %20 : vector<1x1x8x128xf32> to vector<8x128xf32>
    %cst_23 = arith.constant 0.000000e+00 : f32
    %22 = vector.broadcast %cst_23 : f32 to vector<8x128xf32>
    %23 = arith.cmpf oeq, %16, %22 : vector<8x128xf32>
    %24 = arith.mulf %21, %19 : vector<8x128xf32>
    %cst_24 = arith.constant 0.000000e+00 : f32
    %25 = vector.broadcast %cst_24 : f32 to vector<8x128xf32>
    %26 = arith.select %23, %24, %25 : vector<8x128xi1>, vector<8x128xf32>
    %27 = arith.addf %3, %26 : vector<8x128xf32>
    %cst_25 = arith.constant 0.000000e+00 : f32
    %28 = vector.broadcast %cst_25 : f32 to vector<8x128xf32>
    %29 = arith.select %23, %18, %28 : vector<8x128xi1>, vector<8x128xf32>
    %30 = arith.addf %7, %29 : vector<8x128xf32>
    %31 = arith.mulf %21, %24 : vector<8x128xf32>
    %32 = arith.addf %11, %31 : vector<8x128xf32>
    %c0_26 = arith.constant 0 : index
    %c1 = arith.constant 1 : index
    %c0_27 = arith.constant 0 : index
    %c0_28 = arith.constant 0 : index
    %33 = vector.load %arg3[%c0_26, %c1, %c0_27, %c0_28] : memref<1x4x8x128xf32, #tpu.memory_space<vmem>>, vector<1x1x8x128xf32>
    %34 = vector.shape_cast %33 : vector<1x1x8x128xf32> to vector<8x128xf32>
    %cst_29 = arith.constant 1.000000e+00 : f32
    %35 = vector.broadcast %cst_29 : f32 to vector<8x128xf32>
    %36 = arith.cmpf oeq, %16, %35 : vector<8x128xf32>
    %37 = arith.mulf %34, %19 : vector<8x128xf32>
    %cst_30 = arith.constant 0.000000e+00 : f32
    %38 = vector.broadcast %cst_30 : f32 to vector<8x128xf32>
    %39 = arith.select %36, %37, %38 : vector<8x128xi1>, vector<8x128xf32>
    %40 = arith.addf %4, %39 : vector<8x128xf32>
    %cst_31 = arith.constant 0.000000e+00 : f32
    %41 = vector.broadcast %cst_31 : f32 to vector<8x128xf32>
    %42 = arith.select %36, %18, %41 : vector<8x128xi1>, vector<8x128xf32>
    %43 = arith.addf %8, %42 : vector<8x128xf32>
    %44 = arith.mulf %34, %37 : vector<8x128xf32>
    %45 = arith.addf %12, %44 : vector<8x128xf32>
    %c0_32 = arith.constant 0 : index
    %c2 = arith.constant 2 : index
    %c0_33 = arith.constant 0 : index
    %c0_34 = arith.constant 0 : index
    %46 = vector.load %arg3[%c0_32, %c2, %c0_33, %c0_34] : memref<1x4x8x128xf32, #tpu.memory_space<vmem>>, vector<1x1x8x128xf32>
    %47 = vector.shape_cast %46 : vector<1x1x8x128xf32> to vector<8x128xf32>
    %cst_35 = arith.constant 2.000000e+00 : f32
    %48 = vector.broadcast %cst_35 : f32 to vector<8x128xf32>
    %49 = arith.cmpf oeq, %16, %48 : vector<8x128xf32>
    %50 = arith.mulf %47, %19 : vector<8x128xf32>
    %cst_36 = arith.constant 0.000000e+00 : f32
    %51 = vector.broadcast %cst_36 : f32 to vector<8x128xf32>
    %52 = arith.select %49, %50, %51 : vector<8x128xi1>, vector<8x128xf32>
    %53 = arith.addf %5, %52 : vector<8x128xf32>
    %cst_37 = arith.constant 0.000000e+00 : f32
    %54 = vector.broadcast %cst_37 : f32 to vector<8x128xf32>
    %55 = arith.select %49, %18, %54 : vector<8x128xi1>, vector<8x128xf32>
    %56 = arith.addf %9, %55 : vector<8x128xf32>
    %57 = arith.mulf %47, %50 : vector<8x128xf32>
    %58 = arith.addf %13, %57 : vector<8x128xf32>
    %c0_38 = arith.constant 0 : index
    %c3 = arith.constant 3 : index
    %c0_39 = arith.constant 0 : index
    %c0_40 = arith.constant 0 : index
    %59 = vector.load %arg3[%c0_38, %c3, %c0_39, %c0_40] : memref<1x4x8x128xf32, #tpu.memory_space<vmem>>, vector<1x1x8x128xf32>
    %60 = vector.shape_cast %59 : vector<1x1x8x128xf32> to vector<8x128xf32>
    %cst_41 = arith.constant 3.000000e+00 : f32
    %61 = vector.broadcast %cst_41 : f32 to vector<8x128xf32>
    %62 = arith.cmpf oeq, %16, %61 : vector<8x128xf32>
    %63 = arith.mulf %60, %19 : vector<8x128xf32>
    %cst_42 = arith.constant 0.000000e+00 : f32
    %64 = vector.broadcast %cst_42 : f32 to vector<8x128xf32>
    %65 = arith.select %62, %63, %64 : vector<8x128xi1>, vector<8x128xf32>
    %66 = arith.addf %6, %65 : vector<8x128xf32>
    %cst_43 = arith.constant 0.000000e+00 : f32
    %67 = vector.broadcast %cst_43 : f32 to vector<8x128xf32>
    %68 = arith.select %62, %18, %67 : vector<8x128xi1>, vector<8x128xf32>
    %69 = arith.addf %10, %68 : vector<8x128xf32>
    %70 = arith.mulf %60, %63 : vector<8x128xf32>
    %71 = arith.addf %14, %70 : vector<8x128xf32>
    %c0_44 = arith.constant 0 : index
    %c0_45 = arith.constant 0 : index
    %c0_46 = arith.constant 0 : index
    %72 = vector.load %arg9[%c0_44, %c0_45, %c0_46] : memref<4x8x128xf32, #tpu.memory_space<vmem>>, vector<1x8x128xf32>
    %73 = vector.shape_cast %72 : vector<1x8x128xf32> to vector<8x128xf32>
    %74 = arith.addf %73, %27 : vector<8x128xf32>
    %c0_47 = arith.constant 0 : index
    %c0_48 = arith.constant 0 : index
    %c0_49 = arith.constant 0 : index
    %75 = vector.load %arg9[%c0_47, %c0_48, %c0_49] : memref<4x8x128xf32, #tpu.memory_space<vmem>>, vector<1x8x128xf32>
    %76 = vector.shape_cast %75 : vector<1x8x128xf32> to vector<8x128xf32>
    %77 = vector.shape_cast %74 : vector<8x128xf32> to vector<1x8x128xf32>
    tpu.vector_store %arg9[%c0_47, %c0_48, %c0_49], %77 {strides = array<i32>} : memref<4x8x128xf32, #tpu.memory_space<vmem>>, vector<1x8x128xf32>,
    %c0_50 = arith.constant 0 : index
    %c0_51 = arith.constant 0 : index
    %c0_52 = arith.constant 0 : index
    %78 = vector.load %arg10[%c0_50, %c0_51, %c0_52] : memref<4x8x128xf32, #tpu.memory_space<vmem>>, vector<1x8x128xf32>
    %79 = vector.shape_cast %78 : vector<1x8x128xf32> to vector<8x128xf32>
    %80 = arith.addf %79, %30 : vector<8x128xf32>
    %c0_53 = arith.constant 0 : index
    %c0_54 = arith.constant 0 : index
    %c0_55 = arith.constant 0 : index
    %81 = vector.load %arg10[%c0_53, %c0_54, %c0_55] : memref<4x8x128xf32, #tpu.memory_space<vmem>>, vector<1x8x128xf32>
    %82 = vector.shape_cast %81 : vector<1x8x128xf32> to vector<8x128xf32>
    %83 = vector.shape_cast %80 : vector<8x128xf32> to vector<1x8x128xf32>
    tpu.vector_store %arg10[%c0_53, %c0_54, %c0_55], %83 {strides = array<i32>} : memref<4x8x128xf32, #tpu.memory_space<vmem>>, vector<1x8x128xf32>,
    %c0_56 = arith.constant 0 : index
    %c0_57 = arith.constant 0 : index
    %c0_58 = arith.constant 0 : index
    %84 = vector.load %arg11[%c0_56, %c0_57, %c0_58] : memref<4x8x128xf32, #tpu.memory_space<vmem>>, vector<1x8x128xf32>
    %85 = vector.shape_cast %84 : vector<1x8x128xf32> to vector<8x128xf32>
    %86 = arith.addf %85, %32 : vector<8x128xf32>
    %c0_59 = arith.constant 0 : index
    %c0_60 = arith.constant 0 : index
    %c0_61 = arith.constant 0 : index
    %87 = vector.load %arg11[%c0_59, %c0_60, %c0_61] : memref<4x8x128xf32, #tpu.memory_space<vmem>>, vector<1x8x128xf32>
    %88 = vector.shape_cast %87 : vector<1x8x128xf32> to vector<8x128xf32>
    %89 = vector.shape_cast %86 : vector<8x128xf32> to vector<1x8x128xf32>
    tpu.vector_store %arg11[%c0_59, %c0_60, %c0_61], %89 {strides = array<i32>} : memref<4x8x128xf32, #tpu.memory_space<vmem>>, vector<1x8x128xf32>,
    %c1_62 = arith.constant 1 : index
    %c0_63 = arith.constant 0 : index
    %c0_64 = arith.constant 0 : index
    %90 = vector.load %arg9[%c1_62, %c0_63, %c0_64] : memref<4x8x128xf32, #tpu.memory_space<vmem>>, vector<1x8x128xf32>
    %91 = vector.shape_cast %90 : vector<1x8x128xf32> to vector<8x128xf32>
    %92 = arith.addf %91, %40 : vector<8x128xf32>
    %c1_65 = arith.constant 1 : index
    %c0_66 = arith.constant 0 : index
    %c0_67 = arith.constant 0 : index
    %93 = vector.load %arg9[%c1_65, %c0_66, %c0_67] : memref<4x8x128xf32, #tpu.memory_space<vmem>>, vector<1x8x128xf32>
    %94 = vector.shape_cast %93 : vector<1x8x128xf32> to vector<8x128xf32>
    %95 = vector.shape_cast %92 : vector<8x128xf32> to vector<1x8x128xf32>
    tpu.vector_store %arg9[%c1_65, %c0_66, %c0_67], %95 {strides = array<i32>} : memref<4x8x128xf32, #tpu.memory_space<vmem>>, vector<1x8x128xf32>,
    %c1_68 = arith.constant 1 : index
    %c0_69 = arith.constant 0 : index
    %c0_70 = arith.constant 0 : index
    %96 = vector.load %arg10[%c1_68, %c0_69, %c0_70] : memref<4x8x128xf32, #tpu.memory_space<vmem>>, vector<1x8x128xf32>
    %97 = vector.shape_cast %96 : vector<1x8x128xf32> to vector<8x128xf32>
    %98 = arith.addf %97, %43 : vector<8x128xf32>
    %c1_71 = arith.constant 1 : index
    %c0_72 = arith.constant 0 : index
    %c0_73 = arith.constant 0 : index
    %99 = vector.load %arg10[%c1_71, %c0_72, %c0_73] : memref<4x8x128xf32, #tpu.memory_space<vmem>>, vector<1x8x128xf32>
    %100 = vector.shape_cast %99 : vector<1x8x128xf32> to vector<8x128xf32>
    %101 = vector.shape_cast %98 : vector<8x128xf32> to vector<1x8x128xf32>
    tpu.vector_store %arg10[%c1_71, %c0_72, %c0_73], %101 {strides = array<i32>} : memref<4x8x128xf32, #tpu.memory_space<vmem>>, vector<1x8x128xf32>,
    %c1_74 = arith.constant 1 : index
    %c0_75 = arith.constant 0 : index
    %c0_76 = arith.constant 0 : index
    %102 = vector.load %arg11[%c1_74, %c0_75, %c0_76] : memref<4x8x128xf32, #tpu.memory_space<vmem>>, vector<1x8x128xf32>
    %103 = vector.shape_cast %102 : vector<1x8x128xf32> to vector<8x128xf32>
    %104 = arith.addf %103, %45 : vector<8x128xf32>
    %c1_77 = arith.constant 1 : index
    %c0_78 = arith.constant 0 : index
    %c0_79 = arith.constant 0 : index
    %105 = vector.load %arg11[%c1_77, %c0_78, %c0_79] : memref<4x8x128xf32, #tpu.memory_space<vmem>>, vector<1x8x128xf32>
    %106 = vector.shape_cast %105 : vector<1x8x128xf32> to vector<8x128xf32>
    %107 = vector.shape_cast %104 : vector<8x128xf32> to vector<1x8x128xf32>
    tpu.vector_store %arg11[%c1_77, %c0_78, %c0_79], %107 {strides = array<i32>} : memref<4x8x128xf32, #tpu.memory_space<vmem>>, vector<1x8x128xf32>,
    %c2_80 = arith.constant 2 : index
    %c0_81 = arith.constant 0 : index
    %c0_82 = arith.constant 0 : index
    %108 = vector.load %arg9[%c2_80, %c0_81, %c0_82] : memref<4x8x128xf32, #tpu.memory_space<vmem>>, vector<1x8x128xf32>
    %109 = vector.shape_cast %108 : vector<1x8x128xf32> to vector<8x128xf32>
    %110 = arith.addf %109, %53 : vector<8x128xf32>
    %c2_83 = arith.constant 2 : index
    %c0_84 = arith.constant 0 : index
    %c0_85 = arith.constant 0 : index
    %111 = vector.load %arg9[%c2_83, %c0_84, %c0_85] : memref<4x8x128xf32, #tpu.memory_space<vmem>>, vector<1x8x128xf32>
    %112 = vector.shape_cast %111 : vector<1x8x128xf32> to vector<8x128xf32>
    %113 = vector.shape_cast %110 : vector<8x128xf32> to vector<1x8x128xf32>
    tpu.vector_store %arg9[%c2_83, %c0_84, %c0_85], %113 {strides = array<i32>} : memref<4x8x128xf32, #tpu.memory_space<vmem>>, vector<1x8x128xf32>,
    %c2_86 = arith.constant 2 : index
    %c0_87 = arith.constant 0 : index
    %c0_88 = arith.constant 0 : index
    %114 = vector.load %arg10[%c2_86, %c0_87, %c0_88] : memref<4x8x128xf32, #tpu.memory_space<vmem>>, vector<1x8x128xf32>
    %115 = vector.shape_cast %114 : vector<1x8x128xf32> to vector<8x128xf32>
    %116 = arith.addf %115, %56 : vector<8x128xf32>
    %c2_89 = arith.constant 2 : index
    %c0_90 = arith.constant 0 : index
    %c0_91 = arith.constant 0 : index
    %117 = vector.load %arg10[%c2_89, %c0_90, %c0_91] : memref<4x8x128xf32, #tpu.memory_space<vmem>>, vector<1x8x128xf32>
    %118 = vector.shape_cast %117 : vector<1x8x128xf32> to vector<8x128xf32>
    %119 = vector.shape_cast %116 : vector<8x128xf32> to vector<1x8x128xf32>
    tpu.vector_store %arg10[%c2_89, %c0_90, %c0_91], %119 {strides = array<i32>} : memref<4x8x128xf32, #tpu.memory_space<vmem>>, vector<1x8x128xf32>,
    %c2_92 = arith.constant 2 : index
    %c0_93 = arith.constant 0 : index
    %c0_94 = arith.constant 0 : index
    %120 = vector.load %arg11[%c2_92, %c0_93, %c0_94] : memref<4x8x128xf32, #tpu.memory_space<vmem>>, vector<1x8x128xf32>
    %121 = vector.shape_cast %120 : vector<1x8x128xf32> to vector<8x128xf32>
    %122 = arith.addf %121, %58 : vector<8x128xf32>
    %c2_95 = arith.constant 2 : index
    %c0_96 = arith.constant 0 : index
    %c0_97 = arith.constant 0 : index
    %123 = vector.load %arg11[%c2_95, %c0_96, %c0_97] : memref<4x8x128xf32, #tpu.memory_space<vmem>>, vector<1x8x128xf32>
    %124 = vector.shape_cast %123 : vector<1x8x128xf32> to vector<8x128xf32>
    %125 = vector.shape_cast %122 : vector<8x128xf32> to vector<1x8x128xf32>
    tpu.vector_store %arg11[%c2_95, %c0_96, %c0_97], %125 {strides = array<i32>} : memref<4x8x128xf32, #tpu.memory_space<vmem>>, vector<1x8x128xf32>,
    %c3_98 = arith.constant 3 : index
    %c0_99 = arith.constant 0 : index
    %c0_100 = arith.constant 0 : index
    %126 = vector.load %arg9[%c3_98, %c0_99, %c0_100] : memref<4x8x128xf32, #tpu.memory_space<vmem>>, vector<1x8x128xf32>
    %127 = vector.shape_cast %126 : vector<1x8x128xf32> to vector<8x128xf32>
    %128 = arith.addf %127, %66 : vector<8x128xf32>
    %c3_101 = arith.constant 3 : index
    %c0_102 = arith.constant 0 : index
    %c0_103 = arith.constant 0 : index
    %129 = vector.load %arg9[%c3_101, %c0_102, %c0_103] : memref<4x8x128xf32, #tpu.memory_space<vmem>>, vector<1x8x128xf32>
    %130 = vector.shape_cast %129 : vector<1x8x128xf32> to vector<8x128xf32>
    %131 = vector.shape_cast %128 : vector<8x128xf32> to vector<1x8x128xf32>
    tpu.vector_store %arg9[%c3_101, %c0_102, %c0_103], %131 {strides = array<i32>} : memref<4x8x128xf32, #tpu.memory_space<vmem>>, vector<1x8x128xf32>,
    %c3_104 = arith.constant 3 : index
    %c0_105 = arith.constant 0 : index
    %c0_106 = arith.constant 0 : index
    %132 = vector.load %arg10[%c3_104, %c0_105, %c0_106] : memref<4x8x128xf32, #tpu.memory_space<vmem>>, vector<1x8x128xf32>
    %133 = vector.shape_cast %132 : vector<1x8x128xf32> to vector<8x128xf32>
    %134 = arith.addf %133, %69 : vector<8x128xf32>
    %c3_107 = arith.constant 3 : index
    %c0_108 = arith.constant 0 : index
    %c0_109 = arith.constant 0 : index
    %135 = vector.load %arg10[%c3_107, %c0_108, %c0_109] : memref<4x8x128xf32, #tpu.memory_space<vmem>>, vector<1x8x128xf32>
    %136 = vector.shape_cast %135 : vector<1x8x128xf32> to vector<8x128xf32>
    %137 = vector.shape_cast %134 : vector<8x128xf32> to vector<1x8x128xf32>
    tpu.vector_store %arg10[%c3_107, %c0_108, %c0_109], %137 {strides = array<i32>} : memref<4x8x128xf32, #tpu.memory_space<vmem>>, vector<1x8x128xf32>,
    %c3_110 = arith.constant 3 : index
    %c0_111 = arith.constant 0 : index
    %c0_112 = arith.constant 0 : index
    %138 = vector.load %arg11[%c3_110, %c0_111, %c0_112] : memref<4x8x128xf32, #tpu.memory_space<vmem>>, vector<1x8x128xf32>
    %139 = vector.shape_cast %138 : vector<1x8x128xf32> to vector<8x128xf32>
    %140 = arith.addf %139, %71 : vector<8x128xf32>
    %c3_113 = arith.constant 3 : index
    %c0_114 = arith.constant 0 : index
    %c0_115 = arith.constant 0 : index
    %141 = vector.load %arg11[%c3_113, %c0_114, %c0_115] : memref<4x8x128xf32, #tpu.memory_space<vmem>>, vector<1x8x128xf32>
    %142 = vector.shape_cast %141 : vector<1x8x128xf32> to vector<8x128xf32>
    %143 = vector.shape_cast %140 : vector<8x128xf32> to vector<1x8x128xf32>
    tpu.vector_store %arg11[%c3_113, %c0_114, %c0_115], %143 {strides = array<i32>} : memref<4x8x128xf32, #tpu.memory_space<vmem>>, vector<1x8x128xf32>,
    %c0_i32_116 = arith.constant 0 : i32
    %144 = arith.cmpi eq, %arg2, %c0_i32_116 : i32
    %145 = arith.extui %144 : i1 to i32
    %c0_i32_117 = arith.constant 0 : i32
    %146 = arith.cmpi ne, %145, %c0_i32_117 : i32
    scf.if %146 {
      %c0_118 = arith.constant 0 : index
      %c0_119 = arith.constant 0 : index
      %c0_120 = arith.constant 0 : index
      %147 = vector.load %arg9[%c0_118, %c0_119, %c0_120] : memref<4x8x128xf32, #tpu.memory_space<vmem>>, vector<4x8x128xf32>
      %cst_121 = arith.constant dense<0.000000e+00> : vector<4x128xf32>
      %148 = vector.multi_reduction <add>, %147, %cst_121 [1] : vector<4x8x128xf32> to vector<4x128xf32>
      %c0_122 = arith.constant 0 : index
      %c0_123 = arith.constant 0 : index
      %c0_124 = arith.constant 0 : index
      %c0_125 = arith.constant 0 : index
      %149 = vector.load %arg6[%c0_122, %c0_123, %c0_124, %c0_125] : memref<1x1x4x128xf32, #tpu.memory_space<vmem>>, vector<1x1x4x128xf32>
      %150 = vector.shape_cast %149 : vector<1x1x4x128xf32> to vector<4x128xf32>
      %151 = vector.shape_cast %148 : vector<4x128xf32> to vector<1x1x4x128xf32>
      tpu.vector_store %arg6[%c0_122, %c0_123, %c0_124, %c0_125], %151 {strides = array<i32>} : memref<1x1x4x128xf32, #tpu.memory_space<vmem>>, vector<1x1x4x128xf32>,
      %c0_126 = arith.constant 0 : index
      %c0_127 = arith.constant 0 : index
      %c0_128 = arith.constant 0 : index
      %152 = vector.load %arg10[%c0_126, %c0_127, %c0_128] : memref<4x8x128xf32, #tpu.memory_space<vmem>>, vector<4x8x128xf32>
      %cst_129 = arith.constant dense<0.000000e+00> : vector<4x128xf32>
      %153 = vector.multi_reduction <add>, %152, %cst_129 [1] : vector<4x8x128xf32> to vector<4x128xf32>
      %c0_130 = arith.constant 0 : index
      %c0_131 = arith.constant 0 : index
      %c0_132 = arith.constant 0 : index
      %c0_133 = arith.constant 0 : index
      %154 = vector.load %arg7[%c0_130, %c0_131, %c0_132, %c0_133] : memref<1x1x4x128xf32, #tpu.memory_space<vmem>>, vector<1x1x4x128xf32>
      %155 = vector.shape_cast %154 : vector<1x1x4x128xf32> to vector<4x128xf32>
      %156 = vector.shape_cast %153 : vector<4x128xf32> to vector<1x1x4x128xf32>
      tpu.vector_store %arg7[%c0_130, %c0_131, %c0_132, %c0_133], %156 {strides = array<i32>} : memref<1x1x4x128xf32, #tpu.memory_space<vmem>>, vector<1x1x4x128xf32>,
      %c0_134 = arith.constant 0 : index
      %c0_135 = arith.constant 0 : index
      %c0_136 = arith.constant 0 : index
      %157 = vector.load %arg11[%c0_134, %c0_135, %c0_136] : memref<4x8x128xf32, #tpu.memory_space<vmem>>, vector<4x8x128xf32>
      %cst_137 = arith.constant dense<0.000000e+00> : vector<4x128xf32>
      %158 = vector.multi_reduction <add>, %157, %cst_137 [1] : vector<4x8x128xf32> to vector<4x128xf32>
      %c0_138 = arith.constant 0 : index
      %c0_139 = arith.constant 0 : index
      %c0_140 = arith.constant 0 : index
      %c0_141 = arith.constant 0 : index
      %159 = vector.load %arg8[%c0_138, %c0_139, %c0_140, %c0_141] : memref<1x1x4x128xf32, #tpu.memory_space<vmem>>, vector<1x1x4x128xf32>
      %160 = vector.shape_cast %159 : vector<1x1x4x128xf32> to vector<4x128xf32>
      %161 = vector.shape_cast %158 : vector<4x128xf32> to vector<1x1x4x128xf32>
      tpu.vector_store %arg8[%c0_138, %c0_139, %c0_140, %c0_141], %161 {strides = array<i32>} : memref<1x1x4x128xf32, #tpu.memory_space<vmem>>, vector<1x1x4x128xf32>,
    } else {
    }
    return
  }
  func.func @transform_0(%arg0: i32, %arg1: i32, %arg2: i32) -> (i32, i32, i32, i32) {
    %c1_i32 = arith.constant 1 : i32
    %0 = arith.muli %arg1, %c1_i32 : i32
    %1 = arith.addi %0, %arg2 : i32
    %c0_i32 = arith.constant 0 : i32
    %c0_i32_0 = arith.constant 0 : i32
    %c0_i32_1 = arith.constant 0 : i32
    return %arg0, %c0_i32, %1, %c0_i32_0 : i32, i32, i32, i32
  }
  func.func @transform_1(%arg0: i32, %arg1: i32, %arg2: i32) -> (i32, i32, i32, i32) {
    %c1_i32 = arith.constant 1 : i32
    %0 = arith.muli %arg1, %c1_i32 : i32
    %1 = arith.addi %0, %arg2 : i32
    %c0_i32 = arith.constant 0 : i32
    %c0_i32_0 = arith.constant 0 : i32
    %c0_i32_1 = arith.constant 0 : i32
    return %arg0, %c0_i32, %1, %c0_i32_0 : i32, i32, i32, i32
  }
  func.func @transform_2(%arg0: i32, %arg1: i32, %arg2: i32) -> (i32, i32, i32, i32) {
    %c1_i32 = arith.constant 1 : i32
    %0 = arith.muli %arg1, %c1_i32 : i32
    %1 = arith.addi %0, %arg2 : i32
    %c0_i32 = arith.constant 0 : i32
    %c0_i32_0 = arith.constant 0 : i32
    %c0_i32_1 = arith.constant 0 : i32
    return %arg0, %c0_i32, %1, %c0_i32_0 : i32, i32, i32, i32
  }
  func.func @transform_3(%arg0: i32, %arg1: i32, %arg2: i32) -> (i32, i32, i32, i32) {
    %c0_i32 = arith.constant 0 : i32
    %c0_i32_0 = arith.constant 0 : i32
    %c0_i32_1 = arith.constant 0 : i32
    return %arg0, %arg1, %c0_i32, %c0_i32_0 : i32, i32, i32, i32
  }
  func.func @transform_4(%arg0: i32, %arg1: i32, %arg2: i32) -> (i32, i32, i32, i32) {
    %c0_i32 = arith.constant 0 : i32
    %c0_i32_0 = arith.constant 0 : i32
    %c0_i32_1 = arith.constant 0 : i32
    return %arg0, %arg1, %c0_i32, %c0_i32_0 : i32, i32, i32, i32
  }
  func.func @transform_5(%arg0: i32, %arg1: i32, %arg2: i32) -> (i32, i32, i32, i32) {
    %c0_i32 = arith.constant 0 : i32
    %c0_i32_0 = arith.constant 0 : i32
    %c0_i32_1 = arith.constant 0 : i32
    return %arg0, %arg1, %c0_i32, %c0_i32_0 : i32, i32, i32, i32
  }
}

</mosaic_0001>

<bundles_post_ra>
// kernel: dice_loss_weight.1
= control target key start
LH: loop header
LB: loop body
LE: loop exit
PB: predicated region body
PF: predicated region fallthrough
CT: control target
= control target key end

     0   :  { %s883_s18 = smov 0   ;;  %s885_s19 = smov 0   ;;  %s971_s0 = inlined_call_operand.vmem [shape: f32[2,4,8,128], index: 0, kind: input, shape index: {}]   ;;  %s972_s1 = inlined_call_operand.vmem [shape: f32[2,1,8,128], index: 1, kind: input, shape index: {}]   ;;  %s973_s2 = inlined_call_operand.vmem [shape: f32[2,1,8,128], index: 2, kind: input, shape index: {}]   ;;  %s974_s3 = inlined_call_operand.vmem [shape: f32[2,1,4,128], index: 3, kind: output, shape index: {0}]   ;;  %s975_s4 = inlined_call_operand.vmem [shape: f32[2,1,4,128], index: 4, kind: output, shape index: {1}]   ;;  %s976_s5 = inlined_call_operand.vmem [shape: f32[2,1,4,128], index: 5, kind: output, shape index: {2}]  }
   0x1   :  { %s887_s20 = smov 0  }
   0x2 LB: > { %s35_s21 = sadd.s32 1, %s847_s19  ;;  %p791_p0 = scmp.ge.s32.totalorder %s851_s20, 1  ;;  %s851_s20 = sphi %s887_s20, %s16_s20   ;;  %s847_s19 = sphi %s885_s19, %s978_s19   ;;  %s843_s18 = sphi %s883_s18, %s977_s18  }
   0x3   : > { %p37_p1 = scmp.ge.s32.totalorder %s35_s21, 2  ;;  %p262_p2 = scmp.lt.s32.totalorder %s851_s20, 3 }
   0x5   : > { %s980_s21 = smov (%p37_p1, %s35_s21), 0  ;;  %p263_p3 = pnand %p791_p0, %p262_p2 }
   0x6   : > { %p327_p4 = scmp.lt.s32.totalorder (!%p263_p3), %s843_s18, 1  ;;  %vm513_vm4 = vcmask (!%p263_p3), 1041409   ;;  %vm515_vm5 = vcmask (!%p263_p3), 1042434   ;;  %vm517_vm6 = vcmask (!%p263_p3), 1043459  }
   0x7   : > { %266 = sbr.rel (%p263_p3) target bundleno = 53 (0x35), region = 32 }
   0xe   : > { %s982_s18 = smov (!%p327_p4, %s843_s18), 1 }
   0xf   : > { %s804_s22 = sshll.u32 %s982_s18, 5  ;;  %s794_s23 = sshll.u32 %s982_s18, 3 }
  0x10   : > { %s334_s26 = scalar_lea.vmem %s971_s0, %s804_s22  ;;  %s343_s29 = scalar_lea.vmem %s972_s1, %s794_s23 }
  0x11   : > { %s352_s7 = scalar_lea.vmem %s973_s2, %s794_s23  ;;  %v391_v0 = vld [vmem:[%s343_s29] sm:$0xff]  ;;  %v916_v2 = vld [vmem:[%s334_s26 + $0x8] sm:$0xff]  ;;  %v918_v4 = vld [vmem:[%s334_s26 + $0x10] sm:$0xff]  ;;  %s935_s8 = sshll.u32 %s982_s18, 2 }
  0x12   : > { %v914_v1 = vld [vmem:[%s334_s26] sm:$0xff]  ;;  %vm395_vm0 = vcmp.eq.f32.partialorder %v391_v0, 0.0  ;;  %vm405_vm1 = vcmp.eq.f32.partialorder %v391_v0, 1.0  ;;  %vm415_vm2 = vcmp.eq.f32.partialorder %v391_v0, 2.0  ;;  %v920_v5 = vld [vmem:[%s334_s26 + $0x18] sm:$0xff]  ;;  %vm425_vm3 = vcmp.eq.f32.partialorder %v391_v0, 3.0  ;;  %s367_s11 = scalar_lea.vmem %s975_s4, %s935_s8  ;;  %s360_s14 = scalar_lea.vmem %s974_s3, %s935_s8 }
  0x13   : > { %v392_v3 = vld [vmem:[%s352_s7] sm:$0xff]  ;;  %s374_s17 = scalar_lea.vmem %s976_s5, %s935_s8 }
  0x14   : > { %v393_v6 = vmul.f32 %v392_v3, %v392_v3  ;;  %v399_v7 = vsel %vm395_vm0, %v392_v3, 0.0  ;;  %v409_v8 = vsel %vm405_vm1, %v392_v3, 0.0  ;;  %v419_v9 = vsel %vm415_vm2, %v392_v3, 0.0 }
  0x15   : > { %v429_v10 = vsel %vm425_vm3, %v392_v3, 0.0  ;;  %v525_v11 = vrot.slane %v399_v7, 4  ;;  %v531_v12 = vrot.slane %v409_v8, 4  ;;  %v537_v19 = vrot.slane %v419_v9, 4 }
  0x16   : > { %v396_v13 = vmul.f32 %v914_v1, %v393_v6  ;;  %v406_v14 = vmul.f32 %v916_v2, %v393_v6  ;;  %v416_v15 = vmul.f32 %v918_v4, %v393_v6  ;;  %v426_v16 = vmul.f32 %v920_v5, %v393_v6 }
  0x17   : > { %v526_v17 = vadd.f32 %v525_v11, %v399_v7  ;;  %v532_v18 = vadd.f32 %v531_v12, %v409_v8  ;;  %v543_v20 = vrot.slane %v429_v10, 4  ;;  %v538_v31 = vadd.f32 %v537_v19, %v419_v9 }
  0x18   : > { %v397_v21 = vsel %vm395_vm0, %v396_v13, 0.0  ;;  %v407_v22 = vsel %vm405_vm1, %v406_v14, 0.0  ;;  %v417_v23 = vsel %vm415_vm2, %v416_v15, 0.0  ;;  %v427_v24 = vsel %vm425_vm3, %v426_v16, 0.0 }
  0x19   : > { %v485_v25 = vrot.slane %v397_v21, 4  ;;  %v491_v26 = vrot.slane %v407_v22, 4  ;;  %v497_v27 = vrot.slane %v417_v23, 4  ;;  %v503_v28 = vrot.slane %v427_v24, 4 }
  0x1a   : > { %v527_v29 = vrot.slane %v526_v17, 2  ;;  %v533_v30 = vrot.slane %v532_v18, 2  ;;  %v544_v32 = vadd.f32 %v543_v20, %v429_v10  ;;  %v539_v39 = vrot.slane %v538_v31, 2 }
  0x1b   : > { %v486_v33 = vadd.f32 %v485_v25, %v397_v21  ;;  %v492_v34 = vadd.f32 %v491_v26, %v407_v22  ;;  %v498_v35 = vadd.f32 %v497_v27, %v417_v23  ;;  %v504_v36 = vadd.f32 %v503_v28, %v427_v24 }
  0x1c   : > { %v528_v37 = vadd.f32 %v527_v29, %v526_v17  ;;  %v534_v38 = vadd.f32 %v533_v30, %v532_v18  ;;  %v545_v40 = vrot.slane %v544_v32, 2  ;;  %v540_v47 = vadd.f32 %v539_v39, %v538_v31 }
  0x1d   : > { %v487_v41 = vrot.slane %v486_v33, 2  ;;  %v493_v42 = vrot.slane %v492_v34, 2  ;;  %v499_v43 = vrot.slane %v498_v35, 2  ;;  %v505_v44 = vrot.slane %v504_v36, 2 }
  0x1e   : > { %v529_v45 = vrot.slane %v528_v37, 1  ;;  %v535_v46 = vrot.slane %v534_v38, 1  ;;  %v546_v48 = vadd.f32 %v545_v40, %v544_v32  ;;  %v541_v55 = vrot.slane %v540_v47, 1 }
  0x1f   : > { %v488_v49 = vadd.f32 %v487_v41, %v486_v33  ;;  %v494_v50 = vadd.f32 %v493_v42, %v492_v34  ;;  %v500_v51 = vadd.f32 %v499_v43, %v498_v35  ;;  %v506_v52 = vadd.f32 %v505_v44, %v504_v36 }
  0x20   : > { %v530_v53 = vadd.f32 %v529_v45, %v528_v37  ;;  %v536_v54 = vadd.f32 %v535_v46, %v534_v38  ;;  %v547_v56 = vrot.slane %v546_v48, 1  ;;  %v542_v61 = vadd.f32 %v541_v55, %v540_v47 }
  0x21   : > { %v489_v57 = vrot.slane %v488_v49, 1  ;;  %v495_v58 = vrot.slane %v494_v50, 1  ;;  %v501_v59 = vrot.slane %v500_v51, 1  ;;  %v507_v60 = vrot.slane %v506_v52, 1 }
  0x22   : > { %v548_v62 = vadd.f32 %v547_v56, %v546_v48  ;;  %v553_v63 = vsel %vm513_vm4, %v536_v54, %v530_v53  ;;  %v401_v0 = vmul.f32 %v396_v13, %v914_v1  ;;  %v411_v10 = vmul.f32 %v916_v2, %v406_v14 }
  0x23   : > { %v490_v3 = vadd.f32 %v489_v57, %v488_v49  ;;  %v496_v6 = vadd.f32 %v495_v58, %v494_v50  ;;  %v502_v7 = vadd.f32 %v501_v59, %v500_v51  ;;  %v508_v8 = vadd.f32 %v507_v60, %v506_v52 }
  0x24   : > { %v554_v9 = vsel %vm515_vm5, %v542_v61, %v553_v63  ;;  %v421_v11 = vmul.f32 %v918_v4, %v416_v15  ;;  %v431_v12 = vmul.f32 %v920_v5, %v426_v16  ;;  %v562_v17 = vrot.slane %v401_v0, 4 }
  0x25   : > { %v514_v1 = vsel %vm513_vm4, %v496_v6, %v490_v3  ;;  %v555_v13 = vsel %vm517_vm6, %v548_v62, %v554_v9  ;;  %v568_v19 = vrot.slane %v411_v10, 4 }
  0x26   : > { %v516_v18 = vsel %vm515_vm5, %v502_v7, %v514_v1  ;;  %557 = vst [vmem:[%s367_s11] sm:$0xf] %v555_v13  ;;  %v574_v20 = vrot.slane %v421_v11, 4  ;;  %v580_v21 = vrot.slane %v431_v12, 4  ;;  %v563_v4 = vadd.f32 %v562_v17, %v401_v0 }
  0x27   : > { %v518_v2 = vsel %vm517_vm6, %v508_v8, %v516_v18  ;;  %v569_v5 = vadd.f32 %v568_v19, %v411_v10 }
  0x28   : > { %520 = vst [vmem:[%s360_s14] sm:$0xf] %v518_v2  ;;  %v575_v14 = vadd.f32 %v574_v20, %v421_v11  ;;  %v581_v15 = vadd.f32 %v580_v21, %v431_v12  ;;  %v564_v16 = vrot.slane %v563_v4, 2 }
  0x29   : > { %v570_v22 = vrot.slane %v569_v5, 2 }
  0x2a   : > { %v576_v23 = vrot.slane %v575_v14, 2  ;;  %v582_v24 = vrot.slane %v581_v15, 2  ;;  %v565_v25 = vadd.f32 %v564_v16, %v563_v4 }
  0x2b   : > { %v571_v26 = vadd.f32 %v570_v22, %v569_v5 }
  0x2c   : > { %v577_v27 = vadd.f32 %v576_v23, %v575_v14  ;;  %v583_v28 = vadd.f32 %v582_v24, %v581_v15  ;;  %v566_v29 = vrot.slane %v565_v25, 1 }
  0x2d   : > { %v572_v30 = vrot.slane %v571_v26, 1 }
  0x2e   : > { %v578_v31 = vrot.slane %v577_v27, 1  ;;  %v584_v32 = vrot.slane %v583_v28, 1  ;;  %v567_v33 = vadd.f32 %v566_v29, %v565_v25 }
  0x2f   : > { %v573_v34 = vadd.f32 %v572_v30, %v571_v26 }
  0x30   : > { %v579_v35 = vadd.f32 %v578_v31, %v577_v27  ;;  %v585_v36 = vadd.f32 %v584_v32, %v583_v28 }
  0x31   : > { %v590_v37 = vsel %vm513_vm4, %v573_v34, %v567_v33 }
  0x32   : > { %v591_v38 = vsel %vm515_vm5, %v579_v35, %v590_v37 }
  0x33   : > { %v592_v39 = vsel %vm517_vm6, %v585_v36, %v591_v38 }
  0x34   : > { %594 = vst [vmem:[%s374_s17] sm:$0xf] %v592_v39 }
  0x35 PF: > { %s16_s20 = sadd.s32 1, %s851_s20   ;;  %s977_s18 = smov %s847_s19 }
  0x36   : > { %p13_p5 = scmp.ge.s32.totalorder %s16_s20, 4   ;;  %s978_s19 = smov %s980_s21 }
  0x38   :  { %15 = sbr.rel (!%p13_p5) target bundleno = 2 (0x2), region = 112 }

</bundles_post_ra>
